<compile_context>
chip_gen: v6e
topology: v6e:2x2x1
jax: 0.10.0
libtpu: 0.0.40
codegen_flags: <defaults>
</compile_context>

<pallas_src>
import jax
import jax.numpy as jnp
from jax.experimental import pallas as pl
from jax.experimental.pallas import tpu as pltpu


_VMEM_LIMIT = 40 * 1024 * 1024


def _cparams():
    return pltpu.CompilerParams(
        dimension_semantics=("parallel", "parallel"),
        vmem_limit_bytes=_VMEM_LIMIT)


# ----------------------------------------------------------------------------
# Kernels
# ----------------------------------------------------------------------------
def _make_conv3x3_kernel(H, W, act):
    """3x3 'SAME' conv as 3 row-tap matmuls accumulated in-kernel.

    x_ref: (1, (H+2)*W, 3*Cin) bf16   (row-flattened, W-taps folded into K)
    w_ref: (3, 3*Cin, TCO)     bf16   (one K-slab per row tap ky)
    b_ref: (1, TCO)            f32
    o_ref: (1, H*W, TCO)
    """
    M = H * W

    def kernel(x_ref, w_ref, b_ref, o_ref):
        acc = None
        for ky in range(3):
            r0 = ky * W                                   # tile-aligned (W >= 8)
            win = x_ref[0, r0:r0 + M, :]                  # (M, 3*Cin)
            d = jnp.dot(win, w_ref[ky, :, :],
                        preferred_element_type=jnp.float32)
            acc = d if acc is None else acc + d
        r = acc + b_ref[...]
        if act == "leaky":
            r = jnp.where(r >= 0, r, 0.2 * r)             # LeakyReLU(0.2)
        elif act == "tanh":
            r = jnp.tanh(r)
        o_ref[0, :, :] = r.astype(o_ref.dtype)

    return kernel


def _make_deconv_kernel(H, W, C):
    """Polyphase ConvTranspose2d(4, s=2, p=1): 4 phases x 2 row-taps per step.

    x_ref: (1, (H+2)*W, 3*C) bf16
    w_ref: (4, 2, 2*C, TCO)  bf16   (phase, row-tap, col-tap-major K, Cout)
    b_ref: (1, TCO)          f32
    o_ref: (1, 4, H*W, TCO)         (LeakyReLU(0.2) applied in-kernel)
    """
    M = H * W

    def kernel(x_ref, w_ref, b_ref, o_ref):
        b = b_ref[...]
        for ph in range(4):
            sy, sx = ph // 2, ph % 2
            acc = None
            for ty in range(2):
                r0 = (sy + ty) * W                        # tile-aligned rows
                c0 = sx * C                               # lane-aligned channels
                win = x_ref[0, r0:r0 + M, c0:c0 + 2 * C]  # (M, 2*C)
                d = jnp.dot(win, w_ref[ph, ty, :, :],
                            preferred_element_type=jnp.float32)
                acc = d if acc is None else acc + d
            r = acc + b
            r = jnp.where(r >= 0, r, 0.2 * r)             # LeakyReLU(0.2)
            o_ref[0, ph, :, :] = r.astype(o_ref.dtype)

    return kernel


# ----------------------------------------------------------------------------
# Layer wrappers
# ----------------------------------------------------------------------------
def _wcol3(x_bf16):
    """(B,H,W,C) -> (B, (H+2)*W, 3C): pad spatial by 1, fold the 3 column
    shifts into the channel axis, flatten rows (contiguous, free reshape)."""
    B, H, W, C = x_bf16.shape
    xp = jnp.pad(x_bf16, ((0, 0), (1, 1), (1, 1), (0, 0)))
    xc = jnp.concatenate([xp[:, :, j:j + W, :] for j in range(3)], axis=-1)
    return xc.reshape(B, (H + 2) * W, 3 * C)


def conv3x3(x, w3, bias, act, *, tco, out_dtype=jnp.float32):
    """nn.Conv2d(ker=3, stride=1, pad=1) on NHWC input."""
    B, H, W, C = x.shape
    xcol = _wcol3(x.astype(jnp.bfloat16))
    Cout = w3.shape[-1]
    assert Cout % tco == 0
    n_co = Cout // tco
    M, MP = H * W, (H + 2) * W
    out = pl.pallas_call(
        _make_conv3x3_kernel(H, W, act),
        out_shape=jax.ShapeDtypeStruct((B, M, Cout), out_dtype),
        grid=(n_co, B),
        in_specs=[
            pl.BlockSpec((1, MP, 3 * C), lambda co, b: (b, 0, 0)),
            pl.BlockSpec((3, 3 * C, tco), lambda co, b: (0, 0, co)),
            pl.BlockSpec((1, tco), lambda co, b: (0, co)),
        ],
        out_specs=pl.BlockSpec((1, M, tco), lambda co, b: (b, 0, co)),
        compiler_params=_cparams(),
    )(xcol, w3, bias.reshape(1, Cout))
    return out.reshape(B, H, W, Cout)


def conv_transpose_4x4_s2_p1(x, w_poly, bias, *, tco, out_dtype=jnp.bfloat16):
    """nn.ConvTranspose2d(ker=4, stride=2, pad=1) + LeakyReLU(0.2), NHWC."""
    B, H, W, C = x.shape
    Ho, Wo = 2 * H, 2 * W
    He, We = max(H, 8), max(W, 8)
    if (He, We) != (H, W):
        # zero-extend tiny spatial inputs (head: 4x4) so W is sublane-friendly;
        # the valid top-left output corner is sliced off below.
        x = jnp.pad(x, ((0, 0), (0, He - H), (0, We - W), (0, 0)))
    xcol = _wcol3(x.astype(jnp.bfloat16))
    Cout = w_poly.shape[-1]
    assert Cout % tco == 0
    n_co = Cout // tco
    M, MP = He * We, (He + 2) * We
    out = pl.pallas_call(
        _make_deconv_kernel(He, We, C),
        out_shape=jax.ShapeDtypeStruct((B, 4, M, Cout), out_dtype),
        grid=(n_co, B),
        in_specs=[
            pl.BlockSpec((1, MP, 3 * C), lambda co, b: (b, 0, 0)),
            pl.BlockSpec((4, 2, 2 * C, tco), lambda co, b: (0, 0, 0, co)),
            pl.BlockSpec((1, tco), lambda co, b: (0, co)),
        ],
        out_specs=pl.BlockSpec((1, 4, M, tco), lambda co, b: (b, 0, 0, co)),
        compiler_params=_cparams(),
    )(xcol, w_poly, bias.reshape(1, Cout))
    # Interleave the 4 polyphase outputs: (B, 2(sy), 2(sx), He, We, C) -> NHWC.
    out = out.reshape(B, 2, 2, He, We, Cout)
    out = out.transpose(0, 3, 1, 4, 2, 5).reshape(B, 2 * He, 2 * We, Cout)
    return out[:, :Ho, :Wo, :]


def batchnorm_train(x, gamma, beta, eps=1e-5):
    """BatchNorm2d, training-mode batch statistics (biased variance), NHWC/f32."""
    mean = x.mean(axis=(0, 1, 2))
    var = x.var(axis=(0, 1, 2))
    return (x - mean) * jax.lax.rsqrt(var + eps) * gamma + beta


def leaky_relu(x):
    return jnp.where(x >= 0, x, 0.2 * x)


# ----------------------------------------------------------------------------
# One-time weight preparation (hoisted out of the forward pass)
# ----------------------------------------------------------------------------
def prep_conv2d(w_oihw, b, cin_pad=None, cout_pad=None):
    """Conv2d weight (Cout, Cin, 3, 3) -> (3, 3*Cin', Cout') bf16 (kx-major K)."""
    Cout, Cin, KH, KW = w_oihw.shape
    w = jnp.transpose(w_oihw, (2, 3, 1, 0))               # (KH, KW, Cin, Cout)
    if cin_pad is not None and cin_pad > Cin:
        w = jnp.pad(w, ((0, 0), (0, 0), (0, cin_pad - Cin), (0, 0)))
    if cout_pad is not None and cout_pad > Cout:
        w = jnp.pad(w, ((0, 0), (0, 0), (0, 0), (0, cout_pad - Cout)))
        b = jnp.pad(b, (0, cout_pad - Cout))
    kh, kw, ci, co = w.shape
    return w.reshape(kh, kw * ci, co).astype(jnp.bfloat16), b.astype(jnp.float32)


def prep_conv_transpose(w_iohw):
    """ConvTranspose2d weight (Cin, Cout, 4, 4) -> (4, 2, 2*Cin, Cout) bf16.

    Phase (sy, sx), row-tap ty, col-tap tx uses kernel index
    (3 - sy - 2*ty, 3 - sx - 2*tx); K is tx-major, cin-minor.
    """
    phases = []
    for sy in range(2):
        for sx in range(2):
            tys = []
            for ty in range(2):
                taps = [w_iohw[:, :, 3 - sy - 2 * ty, 3 - sx - 2 * tx]   # (Cin, Cout)
                        for tx in range(2)]
                tys.append(jnp.concatenate(taps, axis=0))                # (2*Cin, Cout)
            phases.append(jnp.stack(tys, axis=0))                        # (2, 2*Cin, Cout)
    return jnp.stack(phases, axis=0).astype(jnp.bfloat16)                # (4, 2, 2*Cin, Cout)


# ----------------------------------------------------------------------------
# Parameters (deterministic synthetic init; shapes follow generator.__init__)
# ----------------------------------------------------------------------------
def init_params(key):
    def conv_w(k, cout, cin, kh, kw):            # PyTorch Conv2d layout
        scale = 1.0 / float(kh * kw * cin) ** 0.5
        return scale * jax.random.normal(k, (cout, cin, kh, kw), jnp.float32)

    def convt_w(k, cin, cout, kh, kw):           # PyTorch ConvTranspose2d layout
        scale = 1.0 / float(kh * kw * cin) ** 0.5
        return scale * jax.random.normal(k, (cin, cout, kh, kw), jnp.float32)

    def bias(k, c):
        return 0.01 * jax.random.normal(k, (c,), jnp.float32)

    ks = iter(jax.random.split(key, 18))
    raw = {}
    raw["head_w"], raw["head_b"] = convt_w(next(ks), 256, 256, 4, 4), bias(next(ks), 256)
    raw["b0_w"], raw["b0_b"] = conv_w(next(ks), 512, 256, 3, 3), bias(next(ks), 512)
    raw["b1_w"], raw["b1_b"] = conv_w(next(ks), 1024, 512, 3, 3), bias(next(ks), 1024)
    raw["b2_w"], raw["b2_b"] = convt_w(next(ks), 1024, 1024, 4, 4), bias(next(ks), 1024)
    raw["c0_w"], raw["c0_b"] = conv_w(next(ks), 512, 1024, 3, 3), bias(next(ks), 512)
    raw["c1_w"], raw["c1_b"] = conv_w(next(ks), 256, 512, 3, 3), bias(next(ks), 256)
    raw["c2_w"], raw["c2_b"] = convt_w(next(ks), 256, 256, 4, 4), bias(next(ks), 256)
    raw["t0_w"], raw["t0_b"] = conv_w(next(ks), 64, 256, 3, 3), bias(next(ks), 64)
    raw["t1_w"], raw["t1_b"] = conv_w(next(ks), 3, 64, 3, 3), bias(next(ks), 3)
    for name, c in [("b0", 512), ("b1", 1024), ("c0", 512), ("c1", 256)]:
        raw[name + "_g"] = jnp.ones((c,), jnp.float32)
        raw[name + "_be"] = jnp.zeros((c,), jnp.float32)
    return raw


def prepare_params(raw):
    """One-time conversion to kernel-ready layouts (bf16, flattened, padded)."""
    p = {}
    p["head_w"], p["head_b"] = prep_conv_transpose(raw["head_w"]), raw["head_b"].astype(jnp.float32)
    p["b0_w"], p["b0_b"] = prep_conv2d(raw["b0_w"], raw["b0_b"])
    p["b1_w"], p["b1_b"] = prep_conv2d(raw["b1_w"], raw["b1_b"])
    p["b2_w"], p["b2_b"] = prep_conv_transpose(raw["b2_w"]), raw["b2_b"].astype(jnp.float32)
    p["c0_w"], p["c0_b"] = prep_conv2d(raw["c0_w"], raw["c0_b"])
    p["c1_w"], p["c1_b"] = prep_conv2d(raw["c1_w"], raw["c1_b"])
    p["c2_w"], p["c2_b"] = prep_conv_transpose(raw["c2_w"]), raw["c2_b"].astype(jnp.float32)
    p["t0_w"], p["t0_b"] = prep_conv2d(raw["t0_w"], raw["t0_b"], cout_pad=128)
    p["t1_w"], p["t1_b"] = prep_conv2d(raw["t1_w"], raw["t1_b"], cin_pad=128, cout_pad=128)
    for n in ("b0", "b1", "c0", "c1"):
        p[n + "_g"], p[n + "_be"] = raw[n + "_g"], raw[n + "_be"]
    return p


# ----------------------------------------------------------------------------
# generator.forward
# ----------------------------------------------------------------------------
def generator_forward(x, p):
    B = x.shape[0]
    x = x.reshape(B, 256, 4, 4)                    # NCHW, as in the PyTorch module
    x = jnp.transpose(x, (0, 2, 3, 1))             # -> NHWC (B,4,4,256)

    # head: ConvReComposeBlock(256, 256, 4, 1, 2)  -> (B,8,8,256) bf16
    x = conv_transpose_4x4_s2_p1(x, p["head_w"], p["head_b"], tco=256)

    # body
    x = conv3x3(x, p["b0_w"], p["b0_b"], "none", tco=256)                    # (B,8,8,512) f32
    x = leaky_relu(batchnorm_train(x, p["b0_g"], p["b0_be"]))
    x = conv3x3(x, p["b1_w"], p["b1_b"], "none", tco=512)                    # (B,8,8,1024) f32
    x = leaky_relu(batchnorm_train(x, p["b1_g"], p["b1_be"]))
    x = conv_transpose_4x4_s2_p1(x, p["b2_w"], p["b2_b"], tco=256)           # (B,16,16,1024) bf16

    # body1
    x = conv3x3(x, p["c0_w"], p["c0_b"], "none", tco=256)                    # (B,16,16,512) f32
    x = leaky_relu(batchnorm_train(x, p["c0_g"], p["c0_be"]))
    x = conv3x3(x, p["c1_w"], p["c1_b"], "none", tco=256)                    # (B,16,16,256) f32
    x = leaky_relu(batchnorm_train(x, p["c1_g"], p["c1_be"]))
    x = conv_transpose_4x4_s2_p1(x, p["c2_w"], p["c2_b"], tco=256)           # (B,32,32,256) bf16

    # tail (Cout padded to 128 lanes; real channels sliced at the end)
    x = conv3x3(x, p["t0_w"], p["t0_b"], "none", tco=128,
                out_dtype=jnp.bfloat16)                                      # (B,32,32,128) bf16
    x = conv3x3(x, p["t1_w"], p["t1_b"], "tanh", tco=128)                    # (B,32,32,128) f32
    x = x[..., :3]                                                           # (B,32,32,3)

    return jnp.transpose(x, (0, 3, 1, 2))          # back to NCHW: (B, 3, 32, 32)


if __name__ == "__main__":
    key = jax.random.PRNGKey(0)
    pkey, xkey, k1, k2, k3, k4, k5, k6, k7 = jax.random.split(key, 9)

    # --- self-check 1: 3x3 'SAME' conv vs XLA reference (bf16 in, f32 acc) ---
    xt = jax.random.normal(k1, (2, 8, 8, 128), jnp.float32)
    wt = 0.05 * jax.random.normal(k2, (256, 128, 3, 3), jnp.float32)    # (Cout,Cin,3,3)
    bt = 0.05 * jax.random.normal(k3, (256,), jnp.float32)
    w3, bfl = prep_conv2d(wt, bt)
    got = conv3x3(xt, w3, bfl, "none", tco=128)
    xb = xt.astype(jnp.bfloat16).astype(jnp.float32)
    wb = jnp.transpose(wt, (2, 3, 1, 0)).astype(jnp.bfloat16).astype(jnp.float32)
    ref = jax.lax.conv_general_dilated(
        xb, wb, (1, 1), "SAME", dimension_numbers=("NHWC", "HWIO", "NHWC"),
        precision=jax.lax.Precision.HIGHEST) + bt
    assert jnp.allclose(got, ref, atol=2e-2, rtol=2e-2), float(jnp.max(jnp.abs(got - ref)))

    # --- self-check 2: polyphase ConvTranspose2d(4,2,1)+LeakyReLU vs XLA ---
    xt2 = jax.random.normal(k4, (2, 8, 8, 128), jnp.float32)
    wt2 = 0.05 * jax.random.normal(k5, (128, 256, 4, 4), jnp.float32)   # (Cin,Cout,4,4)
    bt2 = 0.05 * jax.random.normal(k6, (256,), jnp.float32)
    wp = prep_conv_transpose(wt2)
    got2 = conv_transpose_4x4_s2_p1(xt2, wp, bt2, tco=128, out_dtype=jnp.float32)
    xb2 = xt2.astype(jnp.bfloat16).astype(jnp.float32)
    wfl = jnp.transpose(wt2[:, :, ::-1, ::-1], (2, 3, 0, 1)).astype(jnp.bfloat16).astype(jnp.float32)
    ref2 = jax.lax.conv_general_dilated(
        xb2, wfl, (1, 1), ((2, 2), (2, 2)), lhs_dilation=(2, 2),
        dimension_numbers=("NHWC", "HWIO", "NHWC"),
        precision=jax.lax.Precision.HIGHEST) + bt2
    ref2 = leaky_relu(ref2)
    assert got2.shape == (2, 16, 16, 256)
    assert jnp.allclose(got2, ref2, atol=2e-2, rtol=2e-2), float(jnp.max(jnp.abs(got2 - ref2)))

    # --- self-check 3: head path (4x4 input, zero-extension + slice) ---
    xt3 = jax.random.normal(k7, (2, 4, 4, 128), jnp.float32)
    got3 = conv_transpose_4x4_s2_p1(xt3, wp, bt2, tco=256, out_dtype=jnp.float32)
    xb3 = xt3.astype(jnp.bfloat16).astype(jnp.float32)
    ref3 = jax.lax.conv_general_dilated(
        xb3, wfl, (1, 1), ((2, 2), (2, 2)), lhs_dilation=(2, 2),
        dimension_numbers=("NHWC", "HWIO", "NHWC"),
        precision=jax.lax.Precision.HIGHEST) + bt2
    ref3 = leaky_relu(ref3)
    assert got3.shape == (2, 8, 8, 256)
    assert jnp.allclose(got3, ref3, atol=2e-2, rtol=2e-2), float(jnp.max(jnp.abs(got3 - ref3)))

    # --- full generator forward ---
    params = prepare_params(init_params(pkey))     # one-time, outside jit
    x = jax.random.normal(xkey, (2, 256 * 4 * 4), jnp.float32)

    fwd = jax.jit(generator_forward)
    out = jax.block_until_ready(fwd(x, params))

    assert out.shape == (2, 3, 32, 32)
    assert bool(jnp.all(jnp.isfinite(out)))
    assert bool(jnp.all(jnp.abs(out) <= 1.0))      # tanh output range
    print("KERNEL_OK")
</pallas_src>

<mosaic_0001>
module attributes {stable_mosaic.version = 11 : i64} {
  func.func @kernel(%arg0: i32, %arg1: i32, %arg2: memref<1x80x384xbf16, #tpu.memory_space<vmem>>, %arg3: memref<3x384x128xbf16, #tpu.memory_space<vmem>>, %arg4: memref<1x128xf32, #tpu.memory_space<vmem>>, %arg5: memref<1x64x128xf32, #tpu.memory_space<vmem>>) attributes {dimension_semantics = [#tpu.dimension_semantics<parallel>, #tpu.dimension_semantics<parallel>], iteration_bounds = array<i64: 2, 2>, scalar_prefetch = 0 : i64, scratch_operands = 0 : i64, tpu.core_type = #tpu.core_type<tc>, window_params = [{transform_indices = @transform_0, window_bounds = array<i64: 1, 80, 384>}, {transform_indices = @transform_1, window_bounds = array<i64: 3, 384, 128>}, {transform_indices = @transform_2, window_bounds = array<i64: 1, 128>}, {transform_indices = @transform_3, window_bounds = array<i64: 1, 64, 128>}]} {
    %c0 = arith.constant 0 : index
    %c0_0 = arith.constant 0 : index
    %c0_1 = arith.constant 0 : index
    %0 = vector.load %arg2[%c0, %c0_0, %c0_1] : memref<1x80x384xbf16, #tpu.memory_space<vmem>>, vector<1x64x384xbf16>
    %1 = vector.shape_cast %0 : vector<1x64x384xbf16> to vector<64x384xbf16>
    %c0_2 = arith.constant 0 : index
    %c0_3 = arith.constant 0 : index
    %c0_4 = arith.constant 0 : index
    %2 = vector.load %arg3[%c0_2, %c0_3, %c0_4] : memref<3x384x128xbf16, #tpu.memory_space<vmem>>, vector<1x384x128xbf16>
    %3 = vector.shape_cast %2 : vector<1x384x128xbf16> to vector<384x128xbf16>
    %cst = arith.constant dense<0.000000e+00> : vector<64x128xf32>
    %4 = tpu.matmul %1, %3, %cst {dimension_numbers = #tpu.dot_dimension_numbers<[1], [0], [0], [1], [0, 0, 1, 1], [], []>} : vector<64x384xbf16>, vector<384x128xbf16>, vector<64x128xf32> -> vector<64x128xf32>
    %c0_5 = arith.constant 0 : index
    %c8 = arith.constant 8 : index
    %c0_6 = arith.constant 0 : index
    %5 = vector.load %arg2[%c0_5, %c8, %c0_6] : memref<1x80x384xbf16, #tpu.memory_space<vmem>>, vector<1x64x384xbf16>
    %6 = vector.shape_cast %5 : vector<1x64x384xbf16> to vector<64x384xbf16>
    %c1 = arith.constant 1 : index
    %c0_7 = arith.constant 0 : index
    %c0_8 = arith.constant 0 : index
    %7 = vector.load %arg3[%c1, %c0_7, %c0_8] : memref<3x384x128xbf16, #tpu.memory_space<vmem>>, vector<1x384x128xbf16>
    %8 = vector.shape_cast %7 : vector<1x384x128xbf16> to vector<384x128xbf16>
    %cst_9 = arith.constant dense<0.000000e+00> : vector<64x128xf32>
    %9 = tpu.matmul %6, %8, %cst_9 {dimension_numbers = #tpu.dot_dimension_numbers<[1], [0], [0], [1], [0, 0, 1, 1], [], []>} : vector<64x384xbf16>, vector<384x128xbf16>, vector<64x128xf32> -> vector<64x128xf32>
    %10 = arith.addf %4, %9 : vector<64x128xf32>
    %c0_10 = arith.constant 0 : index
    %c16 = arith.constant 16 : index
    %c0_11 = arith.constant 0 : index
    %11 = vector.load %arg2[%c0_10, %c16, %c0_11] : memref<1x80x384xbf16, #tpu.memory_space<vmem>>, vector<1x64x384xbf16>
    %12 = vector.shape_cast %11 : vector<1x64x384xbf16> to vector<64x384xbf16>
    %c2 = arith.constant 2 : index
    %c0_12 = arith.constant 0 : index
    %c0_13 = arith.constant 0 : index
    %13 = vector.load %arg3[%c2, %c0_12, %c0_13] : memref<3x384x128xbf16, #tpu.memory_space<vmem>>, vector<1x384x128xbf16>
    %14 = vector.shape_cast %13 : vector<1x384x128xbf16> to vector<384x128xbf16>
    %cst_14 = arith.constant dense<0.000000e+00> : vector<64x128xf32>
    %15 = tpu.matmul %12, %14, %cst_14 {dimension_numbers = #tpu.dot_dimension_numbers<[1], [0], [0], [1], [0, 0, 1, 1], [], []>} : vector<64x384xbf16>, vector<384x128xbf16>, vector<64x128xf32> -> vector<64x128xf32>
    %16 = arith.addf %10, %15 : vector<64x128xf32>
    %c0_15 = arith.constant 0 : index
    %c0_16 = arith.constant 0 : index
    %17 = vector.load %arg4[%c0_15, %c0_16] : memref<1x128xf32, #tpu.memory_space<vmem>>, vector<1x128xf32>
    %18 = vector.broadcast %17 : vector<1x128xf32> to vector<64x128xf32>
    %19 = arith.addf %16, %18 : vector<64x128xf32>
    %c0_17 = arith.constant 0 : index
    %c0_18 = arith.constant 0 : index
    %c0_19 = arith.constant 0 : index
    %20 = vector.load %arg5[%c0_17, %c0_18, %c0_19] : memref<1x64x128xf32, #tpu.memory_space<vmem>>, vector<1x64x128xf32>
    %21 = vector.shape_cast %20 : vector<1x64x128xf32> to vector<64x128xf32>
    %22 = vector.shape_cast %19 : vector<64x128xf32> to vector<1x64x128xf32>
    tpu.vector_store %arg5[%c0_17, %c0_18, %c0_19], %22 {strides = array<i32>} : memref<1x64x128xf32, #tpu.memory_space<vmem>>, vector<1x64x128xf32>,
    return
  }
  func.func @transform_0(%arg0: i32, %arg1: i32) -> (i32, i32, i32) {
    %c0_i32 = arith.constant 0 : i32
    %c0_i32_0 = arith.constant 0 : i32
    %c0_i32_1 = arith.constant 0 : i32
    return %arg1, %c0_i32, %c0_i32_0 : i32, i32, i32
  }
  func.func @transform_1(%arg0: i32, %arg1: i32) -> (i32, i32, i32) {
    %c0_i32 = arith.constant 0 : i32
    %c0_i32_0 = arith.constant 0 : i32
    %c0_i32_1 = arith.constant 0 : i32
    return %c0_i32, %c0_i32_0, %arg0 : i32, i32, i32
  }
  func.func @transform_2(%arg0: i32, %arg1: i32) -> (i32, i32) {
    %c0_i32 = arith.constant 0 : i32
    %c0_i32_0 = arith.constant 0 : i32
    return %c0_i32, %arg0 : i32, i32
  }
  func.func @transform_3(%arg0: i32, %arg1: i32) -> (i32, i32, i32) {
    %c0_i32 = arith.constant 0 : i32
    %c0_i32_0 = arith.constant 0 : i32
    return %arg1, %c0_i32, %arg0 : i32, i32, i32
  }
}

</mosaic_0001>

<bundles_post_ra>
// kernel: tpu_custom_call.1
= control target key start
LH: loop header
LB: loop body
LE: loop exit
PB: predicated region body
PF: predicated region fallthrough
CT: control target
= control target key end

     0   :  { %s3081_s0 = inlined_call_operand.hbm [shape: bf16[2,80,384], index: 0, kind: input, shape index: {}]   ;;  %s3082_s1 = inlined_call_operand.hbm [shape: bf16[3,384,256], index: 1, kind: input, shape index: {}]   ;;  %s3083_s2 = inlined_call_operand.vmem [shape: f32[1,256], index: 2, kind: input, shape index: {}]   ;;  %s3084_s3 = inlined_call_operand.hbm [shape: f32[2,64,256], index: 3, kind: output, shape index: {}]  }
   0x1   :  { %3094 = sst [smem:[#allocation19_spill]] %s3084_s3 }
   0x2   :  { %8 = vsyncpa [#allocation3], 0 }
   0x3   :  { %10 = vsyncpa [#allocation3 + $0x1], 0 }
   0x4   :  { %11 = vsyncpa [#allocation6], 0 }
   0x5   :  { %13 = vsyncpa [#allocation6 + $0x1], 0 }
   0x6   :  { %14 = vsyncpa [#allocation4], 0 }
   0x7   :  { %16 = vsyncpa [#allocation4 + $0x1], 0  ;;  %s2509_s12 = smov 0   ;;  %s2511_s13 = smov 0  }
   0x8   :  { %s2513_s14 = smov 0   ;;  %s2515_s15 = smov 0  }
   0x9   :  { %s2517_s16 = smov 0   ;;  %s2519_s17 = smov 0  }
   0xa   :  { %s2521_s18 = smov 0   ;;  %s2523_s19 = smov 0  }
   0xb   :  { %s2525_s20 = smov 0   ;;  %s2527_s21 = smov 0  }
   0xc   :  { %s2529_s22 = smov 0   ;;  %s2531_s23 = smov 0  }
   0xd   :  { %s2533_s24 = smov 0   ;;  %s2535_s25 = smov 0  }
   0xe LB: > { %3095 = sst [smem:[#allocation11_spill]] %s2424_s12  ;;  %s1580_s26 = sadd.s32 4294967295, %s2476_s25   ;;  %s2476_s25 = sphi %s2535_s25, %s22_s25   ;;  %s2472_s24 = sphi %s2533_s24, %s3135_s24   ;;  %s2468_s23 = sphi %s2531_s23, %s3134_s23   ;;  %s2464_s22 = sphi %s2529_s22, %s3133_s22   ;;  %s2460_s21 = sphi %s2527_s21, %s3132_s21   ;;  %s2456_s20 = sphi %s2525_s20, %s3122_s20   ;;  %s2452_s19 = sphi %s2523_s19, %s3131_s19   ;;  %s2448_s18 = sphi %s2521_s18, %s3130_s18   ;;  %s2444_s17 = sphi %s2519_s17, %s3129_s17   ;;  %s2440_s16 = sphi %s2517_s16, %s3128_s16   ;;  %s2436_s15 = sphi %s2515_s15, %s3127_s15   ;;  %s2432_s14 = sphi %s2513_s14, %s3120_s14   ;;  %s2428_s13 = sphi %s2511_s13, %s3126_s13   ;;  %s2424_s12 = sphi %s2509_s12, %s3125_s12  }
   0xf   : > { %3096 = sst [smem:[#allocation12_spill]] %s2432_s14  ;;  %s1581_s27 = sadd.s32 4294967294, %s2476_s25  }
  0x10   : > { %3097 = sst [smem:[#allocation13_spill]] %s2456_s20  ;;  %s31_s28 = sadd.s32 1, %s2468_s23 }
  0x11   : > { %s34_s29 = sadd.s32 1, %s2472_s24  ;;  %p32_p0 = scmp.ge.s32.totalorder %s31_s28, 2 }
  0x12   : > { %s41_s30 = sadd.s32 1, %s2456_s20  ;;  %p48_p1 = scmp.ne.s32.totalorder %s2456_s20, %s2452_s19 }
  0x13   : > { %p3093_p2 = scmp.eq.s32.totalorder %s2476_s25, 0  ;;  %s3137_s28 = smov (%p32_p0, %s31_s28), 0 }
  0x14   : > { %3098 = sst [smem:[#allocation14_spill]] %s3137_s28  ;;  %s3139_s29 = smov (!%p32_p0, %s34_s29), %s2472_s24 }
  0x15   : > { %s38_s4 = ssub.s32 %s2468_s23, %s3137_s28  ;;  %p2592_p3 = por %p3093_p2, %p48_p1 }
  0x16   : > { %p36_p4 = scmp.ge.s32.totalorder %s3139_s29, 2  ;;  %p39_p5 = scmp.eq.s32.totalorder %s38_s4, 0 }
  0x17   : > { %p54_p6 = scmp.ne.s32.totalorder %s2452_s19, %s2448_s18  ;;  %p2597_p7 = scmp.eq.s32.totalorder %s1580_s26, 0 }
  0x18   : > { %s3141_s29 = smov (%p36_p4, %s3139_s29), 0  ;;  %s121_s11 = sadd.s32 1, %s2432_s14 }
  0x19   : > { %3101 = sst [smem:[#allocation15_spill]] %s3141_s29  ;;  %p2608_p8 = por %p2597_p7, %p54_p6 }
  0x1a   : > { %s2604_s7 = scalar_select %p39_p5, %s2456_s20, %s41_s30  }
  0x1b   : > { %s2614_s9 = ssub.s32 %s2472_s24, %s3141_s29  ;;  %p131_p11 = scmp.ne.s32.totalorder %s2432_s14, %s2428_s13 }
  0x1c   : > { %3102 = sst [smem:[#allocation16_spill]] %s2604_s7  ;;  %p65_p9 = scmp.eq.s32.totalorder %s2614_s9, 0 }
  0x1d   : > { %s118_s10 = sor.u32 %s2614_s9, %s38_s4  ;;  %p132_p12 = scmp.eq.s32.totalorder %s1580_s26, 3 }
  0x1e   : > { %p119_p10 = scmp.eq.s32.totalorder %s118_s10, 0  ;;  %p137_p0 = scmp.ne.s32.totalorder %s2428_s13, %s2424_s12 }
  0x1f   : > { %p2624_p13 = por %p132_p12, %p131_p11  ;;  %p138_p1 = scmp.eq.s32.totalorder %s1581_s27, 3 }
  0x20   : > { %s2622_s18 = scalar_select %p119_p10, %s2432_s14, %s121_s11  }
  0x21   : > { %p3092_p4 = scmp.lt.s32.totalorder %s2476_s25, 4  ;;  %s158_s29 = sand.u32 1, %s2456_s20  }
  0x22   : > { %3104 = sst [smem:[#allocation17_spill]] %s2622_s18  ;;  %p2632_p5 = por %p138_p1, %p137_p0 }
  0x23   : > { %s2026_s7 = smul.u32 120, %s158_s29  ;;  %p2640_p6 = pnand %p3092_p4, %p2592_p3 }
  0x24   : > { %s3106_s28 = scalar_select %p2632_p5, 1, 0 }
  0x25   : > { %s2027_s26 = smul.u32 1920, %s2468_s23  ;;  %s162_s27 = scalar_lea.vmem [#allocation2], %s2026_s7 }
  0x26   : > { %3107 = sst [smem:[#allocation18_spill]] %s3106_s28  ;;  %s169_s14 = sshll.u32 %s162_s27, 4  ;;  %s170_s14 = int_to_ptr.vmem [resolvable:$true] %s169_s14 }
  0x27   : > { %s168_s18 = scalar_lea.hbm %s3081_s0, %s2027_s26  ;;  %s159_s20 = scalar_lea.sflag [#allocation3], %s158_s29 }
  0x28   : > { %p2274_p10 = pneg %p2640_p6  ;;  %s2285_s28 = scalar_lea.vmem %s170_s14, 1920 }
  0x29   : > { %p2286_p11 = scmp.ne.s32.totalorder %s170_s14, %s2285_s28  ;;  %s2478_s5 = smov [#allocation2]  }
  0x2a   : > { %s2290_s12 = sshll.u32 %s2478_s5, 4  ;;  %s2291_s12 = int_to_ptr.vmem [resolvable:$false] %s2290_s12 }
  0x2b   : > { %p2288_p12 = pnand %p2286_p11, %p2274_p10  ;;  %s2292_s3 = scalar_lea.vmem %s2291_s12, 3840 }
  0x2c   : > { %p2293_p3 = scmp.lt.s32.totalorder %s170_s14, %s2291_s12  ;;  %p2294_p1 = scmp.lt.s32.totalorder %s2292_s3, %s2285_s28 }
  0x2d   : > { %p2289_p0 = pneg %p2288_p12 }
  0x2e   : > { %p2295_p4 = por %p2294_p1, %p2293_p3 }
  0x30   : > { %p2296_p2 = pnand %p2295_p4, %p2289_p0 }
  0x32   : > { %2299 = shalt.err (!%p2296_p2)
}
  0x33   : > { %s2479_s26 = smov 192   ;;  %s2480_s3 = smov 12  }
  0x34   : > { %2040 = dma.hbm_to_vmem [thread:$0]  (!%p2640_p6), %s168_s18, 1920, %s170_s14, %s159_s20, %s2479_s26, %s2479_s26, %s2480_s3  }
  0x35   : > { %p1586_p2 = scmp.ge.s32.totalorder %s2476_s25, 1  ;;  %p203_p4 = scmp.lt.s32.totalorder %s2476_s25, 5 }
  0x36   : > { %s67_s28 = sadd.s32 1, %s2444_s17  ;;  %p74_p11 = scmp.ne.s32.totalorder %s2444_s17, %s2440_s16 }
  0x37   : > { %p2654_p10 = pnand %p1586_p2, %p203_p4  ;;  %p80_p12 = scmp.ne.s32.totalorder %s2440_s16, %s2436_s15 }
  0x38   : > { %s2662_s29 = scalar_select %p65_p9, %s2444_s17, %s67_s28  }
  0x39   : > { %s179_s7 = sand.u32 1, %s2444_s17   ;;  %s1585_s10 = sshll.u32 %s2472_s24, 6 }
  0x3a   : > { %p3110_p0 = scmp.eq.s32.totalorder %s2476_s25, 0  ;;  %p2674_p1 = por %p80_p12, %p2597_p7 }
  0x3b   : > { %s2028_s14 = smul.u32 576, %s179_s7  ;;  %s188_s11 = scalar_lea.hbm %s3082_s1, %s1585_s10 }
  0x3c   : > { %p76_p3 = por %p74_p11, %p3110_p0  ;;  %p3112_p6 = scmp.lt.s32.totalorder %s2476_s25, 4 }
  0x3d   : > { %s183_s15 = scalar_lea.vmem [#allocation5], %s2028_s14  ;;  %s180_s5 = scalar_lea.sflag [#allocation6], %s179_s7 }
  0x3e   : > { %p2683_p2 = pnand %p3112_p6, %p76_p3  ;;  %s189_s27 = sshll.u32 %s183_s15, 4  ;;  %s190_s27 = int_to_ptr.vmem [resolvable:$true] %s189_s27 }
  0x3f   : > { %s2313_s6 = scalar_lea.vmem %s190_s27, 9216  ;;  %s2481_s26 = smov [#allocation5]  }
  0x40   : > { %p2302_p7 = pneg %p2683_p2  ;;  %p2314_p9 = scmp.ne.s32.totalorder %s190_s27, %s2313_s6 }
  0x41   : > { %s2318_s3 = sshll.u32 %s2481_s26, 4  ;;  %s2319_s3 = int_to_ptr.vmem [resolvable:$false] %s2318_s3 }
  0x42   : > { %p2316_p4 = pnand %p2314_p9, %p2302_p7  ;;  %s2320_s28 = scalar_lea.vmem %s2319_s3, 18432 }
  0x43   : > { %p2321_p12 = scmp.lt.s32.totalorder %s190_s27, %s2319_s3  ;;  %p2322_p0 = scmp.lt.s32.totalorder %s2320_s28, %s2313_s6 }
  0x44   : > { %p2317_p11 = pneg %p2316_p4 }
  0x45   : > { %p2323_p3 = por %p2322_p0, %p2321_p12 }
  0x47   : > { %p2324_p6 = pnand %p2323_p3, %p2317_p11 }
  0x49   : > { %2327 = shalt.err (!%p2324_p6)
}
  0x4a   : > { %s2482_s10 = smov 128   ;;  %s2483_s14 = smov 64  }
  0x4b   : > { %s2484_s20 = smov 4   ;;  %207 = sbr.rel (%p2654_p10) target bundleno = 430 (0x1ae), region = 32 }
  0x4c   : > { %2043 = dma.hbm_to_vmem [thread:$0]  (!%p2683_p2), %s188_s11, 9216, %s190_s27, %s180_s5, %s2482_s10, %s2483_s14, %s2484_s20  }
  0x4d   : > { %s209_s7 = sand.u32 (!%p2654_p10), 1, %s2452_s19  }
  0x4e   : > { %s2029_s18 = smul.u32 (!%p2654_p10), 120, %s209_s7  ;;  %s210_s15 = scalar_lea.sflag (!%p2654_p10), [#allocation3], %s209_s7 }
  0x50   : > { %s2694_s26 = scalar_lea.vmem [#allocation2], %s2029_s18 }
  0x51   : > { %2411 = dma.done.wait (%p2608_p8), %s210_s15, 1920  }
  0x52   : > { %2413 = vsyncadd (%p2608_p8), %s210_s15, 4294965376  ;;  %s218_s6 = sand.u32 1, %s2440_s16  }
  0x53   : > { %s2030_s9 = smul.u32 576, %s218_s6  ;;  %s219_s11 = scalar_lea.sflag [#allocation6], %s218_s6 }
  0x55   : > { %s2701_s27 = scalar_lea.vmem [#allocation5], %s2030_s9 }
  0x56   : > { %2415 = dma.done.wait (%p2674_p1), %s219_s11, 9216  }
  0x57   : > { %2417 = vsyncadd (%p2674_p1), %s219_s11, 4294958080  ;;  %v2170_v0 = vld [vmem:[%s2701_s27 + $0x138] sm:$0xff]   ;;  %v2173_v3 = vld [vmem:[%s2701_s27 + $0x130] sm:$0xff]   ;;  %p253_p8 = scmp.lt.s32.totalorder %s2464_s22, 1  ;;  %s250_s12 = sand.u32 1, %s2428_s13  }
  0x58   : > { %v2171_v1 = vld [vmem:[%s2701_s27 + $0xf8] sm:$0xff]   ;;  %1798 = vmatprep.subr.bf16.mxu0 %v2170_v0  ;;  %v2174_v4 = vld [vmem:[%s2701_s27 + $0xf0] sm:$0xff]   ;;  %v2176_v6 = vld [vmem:[%s2701_s27 + $0x128] sm:$0xff]   ;;  %s1587_s28 = sshll.u32 %s250_s12, 6  ;;  %s1794_s14 = sshll.u32 %s2460_s21, 4 }
  0x59   : > { %v2172_v2 = vld [vmem:[%s2701_s27 + $0x178] sm:$0xff]   ;;  %1799 = vmatpush3.bf16.msra.mxu0 %v2171_v1  ;;  %v2175_v5 = vld [vmem:[%s2701_s27 + $0x170] sm:$0xff]   ;;  %v2177_v7 = vld [vmem:[%s2701_s27 + $0xe8] sm:$0xff]   ;;  %s254_s8 = scalar_select %p253_p8, %s2464_s22, 1 }
  0x5a   : > { %1954 = vmatprep.subr.bf16.mxu1 %v2172_v2  ;;  %1800 = vmatprep.subr.bf16.mxu0 %v2173_v3  ;;  %v2178_v8 = vld [vmem:[%s2701_s27 + $0x168] sm:$0xff]   ;;  %v2179_v9 = vld [vmem:[%s2701_s27 + $0x120] sm:$0xff]   ;;  %v2182_v12 = vld [vmem:[%s2701_s27 + $0x118] sm:$0xff]   ;;  %s2955_s10 = scalar_lea.vmem [#allocation7], %s1587_s28  ;;  %s1459_s20 = sadd.s32 %s2464_s22, %s1794_s14 }
  0x5b   : > { %1955 = vmatpush3.bf16.msra.mxu1 %v2172_v2  ;;  %v2180_v10 = vld [vmem:[%s2701_s27 + $0xe0] sm:$0xff]   ;;  %v2184_v13 = vld [vmem:[%s2701_s27 + $0x158] sm:$0xff]   ;;  %v2185_v15 = vld [vmem:[%s2701_s27 + $0x110] sm:$0xff]   ;;  %s255_s3 = scalar_lea.vmem %s3083_s2, %s254_s8  ;;  %s1462_s7 = sshll.u32 %s2955_s10, 4  ;;  %s2994_s7 = int_to_ptr.vmem [resolvable:$true] %s1462_s7 }
  0x5c   : > { %1956 = vmatprep.subr.bf16.mxu1 %v2175_v5  ;;  %v2181_v11 = vld [vmem:[%s2701_s27 + $0x160] sm:$0xff]   ;;  %v2183_v14 = vld [vmem:[%s2701_s27 + $0xd8] sm:$0xff]   ;;  %v2187_v16 = vld [vmem:[%s2701_s27 + $0x150] sm:$0xff]   ;;  %s1795_s21 = sshll.u32 %s1459_s20, 7  ;;  %s3114_s15 = sld [smem:[#allocation19_spill]] }
  0x5d   : > { %1801 = vmatpush3.bf16.msra.mxu0 %v2174_v4  ;;  %v2186_v17 = vld [vmem:[%s2701_s27 + $0xd0] sm:$0xff]   ;;  %v2188_v18 = vld [vmem:[%s2701_s27 + $0x108] sm:$0xff]   ;;  %v2191_v21 = vld [vmem:[%s2701_s27 + $0x100] sm:$0xff]   ;;  %s3006_s9 = scalar_lea.sflag [#allocation4], %s250_s12  ;;  %s2328_s11 = scalar_lea.vmem %s2994_s7, 1024 }
  0x5e   : > { %1802 = vmatprep.subr.bf16.mxu0 %v2176_v6  ;;  %v2189_v19 = vld [vmem:[%s2701_s27 + $0xc8] sm:$0xff]   ;;  %v2730_v22 = vld [vmem:[%s2694_s26 + $0xc] sm:$0xff]  ;;  %v2740_v27 = vld [vmem:[%s2694_s26 + $0x14] sm:$0xf]  ;;  %p2329_p10 = scmp.ne.s32.totalorder %s2994_s7, %s2328_s11 }
  0x5f   : > { %1957 = vmatpush3.bf16.msra.mxu1 %v2175_v5  ;;  %v2190_v20 = vld [vmem:[%s2701_s27 + $0x148] sm:$0xff]   ;;  %v2192_v24 = vld [vmem:[%s2701_s27 + $0xc0] sm:$0xff]   ;;  %v2196_v29 = vld [vmem:[%s2701_s27 + $0x78] sm:$0xff]  }
  0x60   : > { %1958 = vmatprep.subr.bf16.mxu1 %v2178_v8  ;;  %v2733_v23 = vld [vmem:[%s2694_s26 + $0x18] sm:$0xff]  ;;  %v2743_v28 = vld [vmem:[%s2694_s26 + $0x20] sm:$0xf]  ;;  %v2749_v31 = vld [vmem:[%s2694_s26 + $0x2c] sm:$0xf]  ;;  %p2330_p1 = pnand %p2329_p10, %p2624_p13 }
  0x61   : > { %1803 = vmatpush3.bf16.msra.mxu0 %v2177_v7  ;;  %v1637_v25 = vcombine.high %v2730_v22, %v2733_v23  ;;  %v2193_v26 = vld [vmem:[%s2701_s27 + $0x140] sm:$0xff]   ;;  %v1638_v30 = vcombine.low %v2740_v27, %v2743_v28  ;;  %v1636_v33 = vcombine.low %v2730_v22, %v2733_v23  ;;  %v2202_v34 = vld [vmem:[%s2701_s27 + $0xb8] sm:$0xff]   ;;  %v2203_v37 = vld [vmem:[%s2701_s27 + $0x70] sm:$0xff]  }
  0x62   : > { %1804 = vmatprep.subr.bf16.mxu0 %v2179_v9  ;;  %v2752_v32 = vld [vmem:[%s2694_s26 + $0x38] sm:$0xf]  ;;  %v2200_v35 = vld [vmem:[%s2701_s27 + $0x38] sm:$0xff]   ;;  %v2205_v41 = vld [vmem:[%s2701_s27 + $0xb0] sm:$0xff]   ;;  %s3000_s6 = scalar_lea.hbm %s3114_s15, %s1795_s21  ;;  %p2331_p2 = pneg %p2330_p1 }
  0x63   : > { %1959 = vmatpush3.bf16.msra.mxu1 %v2178_v8  ;;  %612 = vmatprep.mubr.bf16.mxu0 %v1637_v25  ;;  %v1641_v36 = vcombine.low %v2749_v31, %v2752_v32  ;;  %v2762_v38 = vld [vmem:[%s2694_s26 + $0x24] sm:$0xff]  ;;  %v2765_v39 = vld [vmem:[%s2694_s26 + $0x30] sm:$0xff]  ;;  %v2778_v48 = vld [vmem:[%s2694_s26 + $0x3c] sm:$0xff] }
  0x64   : > { %1960 = vmatprep.subr.bf16.mxu1 %v2181_v11  ;;  %1970 = vmatprep.mubr.bf16.mxu1 %v1638_v30  ;;  %v1640_v40 = vcombine.high %v2762_v38, %v2765_v39  ;;  %v2204_v42 = vld [vmem:[%s2701_s27 + $0x30] sm:$0xff]   ;;  %v2208_v43 = vld [vmem:[%s2701_s27 + $0x68] sm:$0xff]   ;;  %v1639_v46 = vcombine.low %v2762_v38, %v2765_v39  ;;  %v2211_v50 = vld [vmem:[%s2701_s27 + $0x60] sm:$0xff]  }
  0x65   : > { %1805 = vmatpush3.bf16.msra.mxu0 %v2180_v10  ;;  %v2209_v44 = vld [vmem:[%s2701_s27 + $0x28] sm:$0xff]   ;;  %v258_v45 = vld [vmem:[%s2694_s26 + $0x8] sm:$0xf]  ;;  %v2790_v53 = vld [vmem:[%s2694_s26 + $0x50] sm:$0xf] }
  0x66   : > { %1806 = vmatprep.subr.bf16.mxu0 %v2182_v12  ;;  %v2210_v47 = vld [vmem:[%s2701_s27 + $0xa8] sm:$0xff]   ;;  %v2781_v49 = vld [vmem:[%s2694_s26 + $0x48] sm:$0xff]  ;;  %v2213_v54 = vld [vmem:[%s2701_s27 + $0xa0] sm:$0xff]   ;;  %v1674_v58 = vcombine.low %v258_v45, %v2740_v27 }
  0x67   : > { %1961 = vmatpush3.bf16.msra.mxu1 %v2181_v11  ;;  %v1643_v51 = vcombine.high %v2778_v48, %v2781_v49  ;;  %v2787_v52 = vld [vmem:[%s2694_s26 + $0x44] sm:$0xf]  ;;  %v2796_v56 = vld [vmem:[%s2694_s26 + $0x5c] sm:$0xf]  ;;  %v322_v57 = vld [vmem:[%s2694_s26 + $0x68] sm:$0xf]  ;;  %v1642_v63 = vcombine.low %v2778_v48, %v2781_v49 }
  0x68   : > { %1962 = vmatprep.subr.bf16.mxu1 %v2184_v13  ;;  %v1644_v55 = vcombine.low %v2787_v52, %v2790_v53  ;;  %v2212_v59 = vld [vmem:[%s2701_s27 + $0x20] sm:$0xff]   ;;  %v1647_v60 = vcombine.low %v2796_v56, %v322_v57  ;;  %v2216_v61 = vld [vmem:[%s2701_s27 + $0x58] sm:$0xff]   ;;  %v2811_v2 = vld [vmem:[%s2694_s26 + $0x60] sm:$0xff]  ;;  %v1680_v25 = vcombine.low %v2752_v32, %v2787_v52 }
  0x69   : > { %1807 = vmatpush3.bf16.msra.mxu0 %v2183_v14  ;;  %v2218_v62 = vld [vmem:[%s2701_s27 + $0x18] sm:$0xff]   ;;  %v2221_v3 = vld [vmem:[%s2701_s27 + $0x50] sm:$0xff]   ;;  %v2226_v7 = vld [vmem:[%s2701_s27 + $0x48] sm:$0xff]  }
  0x6a   : > { %1808 = vmatprep.subr.bf16.mxu0 %v2185_v15  ;;  %v2220_v0 = vld [vmem:[%s2701_s27 + $0x98] sm:$0xff]   ;;  %v2223_v5 = vld [vmem:[%s2701_s27 + $0x90] sm:$0xff]   ;;  %v2228_v10 = vld [vmem:[%s2701_s27 + $0x88] sm:$0xff]  }
  0x6b   : > { %1963 = vmatpush3.bf16.msra.mxu1 %v2184_v13  ;;  %v2808_v1 = vld [vmem:[%s2694_s26 + $0x54] sm:$0xff]  ;;  %v2222_v6 = vld [vmem:[%s2701_s27 + $0x10] sm:$0xff]   ;;  %v2268_v52 = vld [vmem:[%s2694_s26 + $0x50] ss:$12 sps:$4 sm:$0xff]  }
  0x6c   : > { %1964 = vmatprep.subr.bf16.mxu1 %v2187_v16  ;;  %v1646_v4 = vcombine.high %v2808_v1, %v2811_v2  ;;  %v257_v8 = vld [vmem:[%s2694_s26] sm:$0xff]  ;;  %v1645_v9 = vcombine.low %v2808_v1, %v2811_v2  ;;  %v2229_v13 = vld [vmem:[%s2701_s27 + $0x40] sm:$0xff]   ;;  %v1681_v45 = vcombine.low %v2781_v49, %v2808_v1 }
  0x6d   : > { %1809 = vmatpush3.bf16.msra.mxu0 %v2186_v17  ;;  %v2227_v11 = vld [vmem:[%s2701_s27 + $0x8] sm:$0xff]   ;;  %v1673_v12 = vcombine.high %v257_v8, %v2730_v22  ;;  %v2231_v14 = vld [vmem:[%s2701_s27 + $0x80] sm:$0xff]   ;;  %v1672_v17 = vcombine.low %v257_v8, %v2730_v22  ;;  %v2239_v22 = vld [vmem:[%s2701_s27 + $0x230] sm:$0xff]  }
  0x6e   : > { %1810 = vmatprep.subr.bf16.mxu0 %v2188_v18  ;;  %v2230_v15 = vld [vmem:[%s2701_s27] sm:$0xff]   ;;  %v2236_v18 = vld [vmem:[%s2701_s27 + $0x238] sm:$0xff]   ;;  %v2242_v27 = vld [vmem:[%s2701_s27 + $0x1e8] sm:$0xff]  }
  0x6f   : > { %1965 = vmatpush3.bf16.msra.mxu1 %v2187_v16  ;;  %v2234_v16 = vld [vmem:[%s2701_s27 + $0x1f8] sm:$0xff]   ;;  %v2243_v30 = vld [vmem:[%s2701_s27 + $0x1a8] sm:$0xff]   ;;  %v2245_v32 = vld [vmem:[%s2701_s27 + $0x1e0] sm:$0xff]  }
  0x70   : > { %1966 = vmatprep.subr.bf16.mxu1 %v2190_v20 }
  0x71   : > { %1811 = vmatpush3.bf16.msra.mxu0 %v2189_v19  ;;  %v2235_v19 = vld [vmem:[%s2701_s27 + $0x1b8] sm:$0xff]  }
  0x72   : > { %1812 = vmatprep.subr.bf16.mxu0 %v2191_v21  ;;  %v1677_v21 = vcombine.low %v2743_v28, %v2749_v31  ;;  %v1675_v28 = vcombine.low %v2733_v23, %v2762_v38  ;;  %v1679_v31 = vcombine.high %v2765_v39, %v2778_v48 }
  0x73   : > { %1967 = vmatpush3.bf16.msra.mxu1 %v2190_v20  ;;  %v2834_v20 = vcombine.high %v2733_v23, %v2762_v38  ;;  %v2246_v23 = vld [vmem:[%s2701_s27 + $0x1a0] sm:$0xff]   ;;  %v2266_v38 = vld [vmem:[%s2694_s26 + $0x20] ss:$12 sps:$4 sm:$0xff]  }
  0x74   : > { %1968 = vmatprep.subr.bf16.mxu1 %v2193_v26 }
  0x75   : > { %1813 = vmatpush3.bf16.msra.mxu0 %v2192_v24  ;;  %v2237_v24 = vld [vmem:[%s2701_s27 + $0x1f0] sm:$0xff]  }
  0x76   : > { %1850 = vmatprep.subr.bf16.mxu0 %v2196_v29  ;;  %v2244_v29 = vld [vmem:[%s2701_s27 + $0x228] sm:$0xff]  }
  0x77   : > { %1969 = vmatpush3.bf16.msra.mxu1 %v2193_v26  ;;  %v2238_v26 = vld [vmem:[%s2701_s27 + $0x1b0] sm:$0xff]  }
  0x78   : > { %613 = vmatmul.mubr.bf16.vlgmr.msra.gmra.mxu0 %v1636_v33  ;;  %1978 = vmatprep.subr.bf16.mxu1 %v2202_v34  ;;  %v1683_v33 = vcombine.low %v2790_v53, %v2796_v56  ;;  %v2269_v53 = vld [vmem:[%s2694_s26 + $0x68] ss:$12 sps:$4 sm:$0xff]  }
  0x79   : > { %1851 = vmatpush3.bf16.msra.mxu0 %v2200_v35  ;;  %620 = vmatprep.mubr.bf16.mxu0 %v1640_v40  ;;  %v2250_v35 = vld [vmem:[%s2701_s27 + $0x1d8] sm:$0xff]  }
  0x7a   : > { %1971 = vmatmul.mubr.bf16.vlgmr.msra.gmra.mxu1 %v1641_v36  ;;  %1852 = vmatprep.subr.bf16.mxu0 %v2203_v37  ;;  %v2252_v36 = vld [vmem:[%s2701_s27 + $0x218] sm:$0xff]   ;;  %v1678_v37 = vcombine.low %v2765_v39, %v2778_v48  ;;  %v2256_v39 = vld [vmem:[%s2701_s27 + $0x190] sm:$0xff]   ;;  %v2263_v48 = vld [vmem:[%s2701_s27 + $0x1c0] sm:$0xff]  }
  0x7b   : > { %1979 = vmatpush3.bf16.msra.mxu1 %v2202_v34  ;;  %1974 = vmatprep.mubr.bf16.mxu1 %v1644_v55  ;;  %v2247_v34 = vld [vmem:[%s2701_s27 + $0x220] sm:$0xff]   ;;  %v2251_v40 = vld [vmem:[%s2701_s27 + $0x198] sm:$0xff]  }
  0x7c   : > { %1980 = vmatprep.subr.bf16.mxu1 %v2205_v41 }
  0x7d   : > { %1853 = vmatpush3.bf16.msra.mxu0 %v2204_v42  ;;  %v2255_v42 = vld [vmem:[%s2701_s27 + $0x1d0] sm:$0xff]  }
  0x7e   : > { %1854 = vmatprep.subr.bf16.mxu0 %v2208_v43  ;;  %v2257_v43 = vld [vmem:[%s2701_s27 + $0x210] sm:$0xff]  }
  0x7f   : > { %1981 = vmatpush3.bf16.msra.mxu1 %v2205_v41  ;;  %v1682_v41 = vcombine.high %v2781_v49, %v2808_v1  ;;  %v2267_v49 = vld [vmem:[%s2694_s26 + $0x38] ss:$12 sps:$4 sm:$0xff]  }
  0x80   : > { %621 = vmatmul.mubr.bf16.gmra.mxu0 %v1639_v46  ;;  %1982 = vmatprep.subr.bf16.mxu1 %v2210_v47  ;;  %v2262_v46 = vld [vmem:[%s2701_s27 + $0x208] sm:$0xff]  }
  0x81   : > { %1855 = vmatpush3.bf16.msra.mxu0 %v2209_v44  ;;  %628 = vmatprep.mubr.bf16.mxu0 %v1643_v51  ;;  %v2260_v44 = vld [vmem:[%s2701_s27 + $0x1c8] sm:$0xff]   ;;  %v2264_v51 = vld [vmem:[%s2701_s27 + $0x180] sm:$0xff]  }
  0x82   : > { %1856 = vmatprep.subr.bf16.mxu0 %v2211_v50  ;;  %1975 = vmatmul.mubr.bf16.gmra.mxu1 %v1647_v60  ;;  %v2265_v50 = vld [vmem:[%s2701_s27 + $0x200] sm:$0xff]  }
  0x83   : > { %1983 = vmatpush3.bf16.msra.mxu1 %v2210_v47  ;;  %1994 = vmatprep.mubr.bf16.mxu1 %v1674_v58  ;;  %v2261_v47 = vld [vmem:[%s2701_s27 + $0x188] sm:$0xff]   ;;  %s2485_s27 = smov [#allocation7]  }
  0x84   : > { %1984 = vmatprep.subr.bf16.mxu1 %v2213_v54  ;;  %s2332_s8 = sshll.u32 %s2485_s27, 4  ;;  %s2333_s8 = int_to_ptr.vmem [resolvable:$false] %s2332_s8 }
  0x85   : > { %1857 = vmatpush3.bf16.msra.mxu0 %v2212_v59  ;;  %s2334_s4 = scalar_lea.vmem %s2333_s8, 2048  ;;  %p2335_p7 = scmp.lt.s32.totalorder %s2994_s7, %s2333_s8 }
  0x86   : > { %1858 = vmatprep.subr.bf16.mxu0 %v2216_v61  ;;  %p2336_p9 = scmp.lt.s32.totalorder %s2334_s4, %s2328_s11 }
  0x87   : > { %1985 = vmatpush3.bf16.msra.mxu1 %v2213_v54  ;;  %v1027_v54 = vld [vmem:[%s2694_s26 + $0x6c] sm:$0xff]  ;;  %s3115_s26 = smov %s3114_s15 }
  0x88   : > { %629 = vmatmul.mubr.bf16.gmra.mxu0 %v1642_v63  ;;  %1986 = vmatprep.subr.bf16.mxu1 %v2220_v0  ;;  %v1766_v55 = vcombine.high %v2811_v2, %v1027_v54  ;;  %v1765_v56 = vcombine.low %v2811_v2, %v1027_v54  ;;  %p2337_p4 = por %p2336_p9, %p2335_p7 }
  0x89   : > { %1859 = vmatpush3.bf16.msra.mxu0 %v2218_v62  ;;  %636 = vmatprep.mubr.bf16.mxu0 %v1646_v4 }
  0x8a   : > { %1860 = vmatprep.subr.bf16.mxu0 %v2221_v3  ;;  %p2338_p11 = pnand %p2337_p4, %p2331_p2 }
  0x8b   : > { %1987 = vmatpush3.bf16.msra.mxu1 %v2220_v0 }
  0x8c   : > { %1988 = vmatprep.subr.bf16.mxu1 %v2223_v5 }
  0x8d   : > { %1861 = vmatpush3.bf16.msra.mxu0 %v2222_v6 }
  0x8e   : > { %1862 = vmatprep.subr.bf16.mxu0 %v2226_v7 }
  0x8f   : > { %1989 = vmatpush3.bf16.msra.mxu1 %v2223_v5 }
  0x90   : > { %637 = vmatmul.mubr.bf16.gmra.mxu0 %v1645_v9  ;;  %1990 = vmatprep.subr.bf16.mxu1 %v2228_v10 }
  0x91   : > { %1863 = vmatpush3.bf16.msra.mxu0 %v2227_v11  ;;  %915 = vmatprep.mubr.bf16.mxu0 %v1673_v12 }
  0x92   : > { %1864 = vmatprep.subr.bf16.mxu0 %v2229_v13 }
  0x93   : > { %1991 = vmatpush3.bf16.msra.mxu1 %v2228_v10 }
  0x94   : > { %1992 = vmatprep.subr.bf16.mxu1 %v2231_v14 }
  0x95   : > { %1865 = vmatpush3.bf16.msra.mxu0 %v2230_v15 }
  0x96   : > { %1902 = vmatprep.subr.bf16.mxu0 %v2234_v16 }
  0x97   : > { %1993 = vmatpush3.bf16.msra.mxu1 %v2231_v14 }
  0x98   : > { %916 = vmatmul.mubr.bf16.vlgmr.msra.gmra.mxu0 %v1672_v17  ;;  %2002 = vmatprep.subr.bf16.mxu1 %v2236_v18 }
  0x99   : > { %1903 = vmatpush3.bf16.msra.mxu0 %v2235_v19  ;;  %923 = vmatprep.mubr.bf16.mxu0 %v2834_v20 }
  0x9a   : > { %1995 = vmatmul.mubr.bf16.vlgmr.msra.gmra.mxu1 %v1677_v21  ;;  %1904 = vmatprep.subr.bf16.mxu0 %v2237_v24 }
  0x9b   : > { %2003 = vmatpush3.bf16.msra.mxu1 %v2236_v18  ;;  %1998 = vmatprep.mubr.bf16.mxu1 %v1680_v25 }
  0x9c   : > { %2004 = vmatprep.subr.bf16.mxu1 %v2239_v22 }
  0x9d   : > { %1905 = vmatpush3.bf16.msra.mxu0 %v2238_v26 }
  0x9e   : > { %1906 = vmatprep.subr.bf16.mxu0 %v2242_v27 }
  0x9f   : > { %2005 = vmatpush3.bf16.msra.mxu1 %v2239_v22 }
  0xa0   : > { %924 = vmatmul.mubr.bf16.gmra.mxu0 %v1675_v28  ;;  %2006 = vmatprep.subr.bf16.mxu1 %v2244_v29 }
  0xa1   : > { %1907 = vmatpush3.bf16.msra.mxu0 %v2243_v30  ;;  %931 = vmatprep.mubr.bf16.mxu0 %v1679_v31 }
  0xa2   : > { %1908 = vmatprep.subr.bf16.mxu0 %v2245_v32  ;;  %1999 = vmatmul.mubr.bf16.gmra.mxu1 %v1683_v33 }
  0xa3   : > { %2007 = vmatpush3.bf16.msra.mxu1 %v2244_v29  ;;  %2018 = vmatprep.mubr.bf16.mxu1 %v2266_v38 }
  0xa4   : > { %2008 = vmatprep.subr.bf16.mxu1 %v2247_v34 }
  0xa5   : > { %1909 = vmatpush3.bf16.msra.mxu0 %v2246_v23 }
  0xa6   : > { %1910 = vmatprep.subr.bf16.mxu0 %v2250_v35 }
  0xa7   : > { %2009 = vmatpush3.bf16.msra.mxu1 %v2247_v34 }
  0xa8   : > { %932 = vmatmul.mubr.bf16.gmra.mxu0 %v1678_v37  ;;  %2010 = vmatprep.subr.bf16.mxu1 %v2252_v36 }
  0xa9   : > { %1911 = vmatpush3.bf16.msra.mxu0 %v2251_v40  ;;  %939 = vmatprep.mubr.bf16.mxu0 %v1682_v41 }
  0xaa   : > { %1912 = vmatprep.subr.bf16.mxu0 %v2255_v42 }
  0xab   : > { %2011 = vmatpush3.bf16.msra.mxu1 %v2252_v36 }
  0xac   : > { %2012 = vmatprep.subr.bf16.mxu1 %v2257_v43 }
  0xad   : > { %1913 = vmatpush3.bf16.msra.mxu0 %v2256_v39 }
  0xae   : > { %1914 = vmatprep.subr.bf16.mxu0 %v2260_v44 }
  0xaf   : > { %2013 = vmatpush3.bf16.msra.mxu1 %v2257_v43 }
  0xb0   : > { %940 = vmatmul.mubr.bf16.gmra.mxu0 %v1681_v45  ;;  %2014 = vmatprep.subr.bf16.mxu1 %v2262_v46 }
  0xb1   : > { %1915 = vmatpush3.bf16.msra.mxu0 %v2261_v47  ;;  %1318 = vmatprep.mubr.bf16.mxu0 %v2834_v20 }
  0xb2   : > { %1916 = vmatprep.subr.bf16.mxu0 %v2263_v48 }
  0xb3   : > { %2015 = vmatpush3.bf16.msra.mxu1 %v2262_v46 }
  0xb4   : > { %2016 = vmatprep.subr.bf16.mxu1 %v2265_v50 }
  0xb5   : > { %1917 = vmatpush3.bf16.msra.mxu0 %v2264_v51 }
  0xb7   : > { %2017 = vmatpush3.bf16.msra.mxu1 %v2265_v50 }
  0xb8   : > { %1319 = vmatmul.mubr.bf16.vlgmr.msra.gmra.mxu0 %v1675_v28 }
  0xb9   : > { %1326 = vmatprep.mubr.bf16.mxu0 %v1679_v31 }
  0xba   : > { %2019 = vmatmul.mubr.bf16.vlgmr.msra.gmra.mxu1 %v2267_v49 }
  0xbb   : > { %2022 = vmatprep.mubr.bf16.mxu1 %v2268_v52 }
  0xc0   : > { %1327 = vmatmul.mubr.bf16.gmra.mxu0 %v1678_v37 }
  0xc1   : > { %1334 = vmatprep.mubr.bf16.mxu0 %v1682_v41 }
  0xc2   : > { %2023 = vmatmul.mubr.bf16.gmra.mxu1 %v2269_v53 }
  0xc8   : > { %1335 = vmatmul.mubr.bf16.gmra.mxu0 %v1681_v45 }
  0xc9   : > { %1342 = vmatprep.mubr.bf16.mxu0 %v1766_v55 }
  0xd0   : > { %1343 = vmatmul.mubr.bf16.gmra.mxu0 %v1765_v56 }
 0x138   : > { %v1814_v57 = vpop.f32.mrf.mxu0 }
 0x13a   : > { %v1815_v58 = vpop.f32.mrf.mxu0  ;;  %v2882_v62 = vpop.f32.mrf.mxu1 }
 0x13b   : > { %v1816_v37 = vadd.f32 %v1815_v58, %v1814_v57 }
 0x13c   : > { %v1817_v59 = vpop.f32.mrf.mxu0  ;;  %v679_v1 = vpop.f32.mrf.mxu1 }
 0x13d   : > { %v680_v43 = vadd.f32 %v1816_v37, %v679_v1 }
 0x13e   : > { %v1818_v60 = vpop.f32.mrf.mxu0  ;;  %v2890_v5 = vpop.f32.mrf.mxu1 }
 0x13f   : > { %v1819_v39 = vadd.f32 %v1818_v60, %v1817_v59  ;;  %v2947_v60 = vld [vmem:[%s255_s3] ss:$0 sm:$0xff] }
 0x140   : > { %v1820_v61 = vpop.f32.mrf.mxu0  ;;  %v682_v7 = vpop.f32.mrf.mxu1 }
 0x141   : > { %v683_v49 = vadd.f32 %v1819_v39, %v682_v7 }
 0x142   : > { %v1821_v63 = vpop.f32.mrf.mxu0  ;;  %v2898_v9 = vpop.f32.mrf.mxu1 }
 0x143   : > { %v1822_v48 = vadd.f32 %v1821_v63, %v1820_v61 }
 0x144   : > { %v2884_v0 = vpop.f32.mrf.mxu0  ;;  %v2904_v12 = vpop.f32.mrf.mxu1 }
 0x145   : > { %v688_v59 = vadd.f32 %v2882_v62, %v1822_v48 }
 0x146   : > { %v2886_v3 = vpop.f32.mrf.mxu0  ;;  %v2910_v15 = vpop.f32.mrf.mxu1 }
 0x147   : > { %v1825_v1 = vadd.f32 %v2886_v3, %v2884_v0 }
 0x148   : > { %v2888_v4 = vpop.f32.mrf.mxu0  ;;  %v2912_v18 = vpop.f32.mrf.mxu1 }
 0x149   : > { %v691_v62 = vadd.f32 %v2890_v5, %v1825_v1 }
 0x14a   : > { %v2892_v6 = vpop.f32.mrf.mxu0 }
 0x14b   : > { %v1828_v39 = vadd.f32 %v2892_v6, %v2888_v4 }
 0x14c   : > { %v2894_v2 = vpop.f32.mrf.mxu0 }
 0x14d   : > { %v696_v6 = vadd.f32 %v1828_v39, %v2904_v12 }
 0x14e   : > { %v2896_v8 = vpop.f32.mrf.mxu0 }
 0x14f   : > { %v1831_v5 = vadd.f32 %v2896_v8, %v2894_v2 }
 0x150   : > { %v2900_v10 = vpop.f32.mrf.mxu0 }
 0x151   : > { %v699_v2 = vadd.f32 %v1831_v5, %v2912_v18 }
 0x152   : > { %v2902_v11 = vpop.f32.mrf.mxu0 }
 0x153   : > { %v1834_v12 = vadd.f32 %v2902_v11, %v2900_v10 }
 0x154   : > { %v2906_v13 = vpop.f32.mrf.mxu0 }
 0x156   : > { %v2908_v14 = vpop.f32.mrf.mxu0 }
 0x157   : > { %v1837_v10 = vadd.f32 %v2908_v14, %v2906_v13 }
 0x158   : > { %v1866_v16 = vpop.f32.mrf.mxu0 }
 0x15a   : > { %v1867_v17 = vpop.f32.mrf.mxu0  ;;  %v2914_v20 = vpop.f32.mrf.mxu1 }
 0x15b   : > { %v1868_v41 = vadd.f32 %v1867_v17, %v1866_v16 }
 0x15c   : > { %v1869_v19 = vpop.f32.mrf.mxu0  ;;  %v982_v25 = vpop.f32.mrf.mxu1 }
 0x15d   : > { %v918_v47 = vadd.f32 %v1868_v41, %v680_v43 }
 0x15e   : > { %v1870_v21 = vpop.f32.mrf.mxu0  ;;  %v2916_v27 = vpop.f32.mrf.mxu1 }
 0x15f   : > { %v1871_v46 = vadd.f32 %v1870_v21, %v1869_v19  ;;  %v983_v56 = vadd.f32 %v982_v25, %v918_v47 }
 0x160   : > { %v1872_v24 = vpop.f32.mrf.mxu0  ;;  %v985_v30 = vpop.f32.mrf.mxu1 }
 0x161   : > { %v921_v57 = vadd.f32 %v1871_v46, %v683_v49 }
 0x162   : > { %v1873_v22 = vpop.f32.mrf.mxu0  ;;  %v2920_v33 = vpop.f32.mrf.mxu1 }
 0x163   : > { %v1874_v53 = vadd.f32 %v1873_v22, %v1872_v24  ;;  %v986_v24 = vadd.f32 %v985_v30, %v921_v57 }
 0x164   : > { %v1875_v26 = vpop.f32.mrf.mxu0  ;;  %v2924_v23 = vpop.f32.mrf.mxu1 }
 0x165   : > { %v926_v17 = vadd.f32 %v1874_v53, %v688_v59 }
 0x166   : > { %v1876_v28 = vpop.f32.mrf.mxu0  ;;  %v2931_v38 = vpop.f32.mrf.mxu1 }
 0x167   : > { %v1877_v25 = vadd.f32 %v1876_v28, %v1875_v26  ;;  %v991_v30 = vadd.f32 %v2914_v20, %v926_v17 }
 0x168   : > { %v1878_v29 = vpop.f32.mrf.mxu0  ;;  %v2938_v44 = vpop.f32.mrf.mxu1 }
 0x169   : > { %v929_v28 = vadd.f32 %v1877_v25, %v691_v62 }
 0x16a   : > { %v1879_v31 = vpop.f32.mrf.mxu0 }
 0x16c   : > { %v2918_v32 = vpop.f32.mrf.mxu0 }
 0x16e   : > { %v2922_v34 = vpop.f32.mrf.mxu0 }
 0x16f   : > { %v1883_v20 = vadd.f32 %v2922_v34, %v2918_v32 }
 0x170   : > { %v2926_v35 = vpop.f32.mrf.mxu0 }
 0x171   : > { %v937_v57 = vadd.f32 %v1883_v20, %v699_v2 }
 0x172   : > { %v2928_v36 = vpop.f32.mrf.mxu0 }
 0x174   : > { %v2933_v40 = vpop.f32.mrf.mxu0 }
 0x176   : > { %v2935_v42 = vpop.f32.mrf.mxu0 }
 0x178   : > { %v1918_v45 = vpop.f32.mrf.mxu0 }
 0x17a   : > { %v1919_v50 = vpop.f32.mrf.mxu0  ;;  %v2020_v51 = vpop.f32.mrf.mxu1 }
 0x17b   : > { %v1920_v52 = vadd.f32 %v1919_v50, %v1918_v45  ;;  %v1880_v45 = vadd.f32 %v1879_v31, %v1878_v29  ;;  %v994_v29 = vadd.f32 %v2916_v27, %v929_v28  ;;  %v1886_v27 = vadd.f32 %v2928_v36, %v2926_v35 }
 0x17c   : > { %v1921_v54 = vpop.f32.mrf.mxu0  ;;  %v1385_v55 = vpop.f32.mrf.mxu1  ;;  %v1889_v35 = vadd.f32 %v2935_v42, %v2933_v40 }
 0x17d   : > { %v1386_v58 = vadd.f32 %v1920_v52, %v1385_v55  ;;  %v934_v31 = vadd.f32 %v1880_v45, %v696_v6 }
 0x17e   : > { %v1922_v61 = vpop.f32.mrf.mxu0  ;;  %v2021_v63 = vpop.f32.mrf.mxu1 }
 0x17f   : > { %v1416_v7 = vadd.f32 %v1386_v58, %v983_v56  ;;  %v1923_v16 = vadd.f32 %v1922_v61, %v1921_v54  ;;  %v999_v34 = vadd.f32 %v2924_v23, %v934_v31  ;;  %v1002_v23 = vadd.f32 %v2938_v44, %v937_v57 }
 0x180   : > { %v1924_v19 = vpop.f32.mrf.mxu0  ;;  %v1388_v21 = vpop.f32.mrf.mxu1 }
 0x181   : > { %v1431_v22 = vadd.f32 %v2947_v60, %v1416_v7  ;;  %v1389_v37 = vadd.f32 %v1923_v16, %v1388_v21 }
 0x182   : > { %v1925_v41 = vpop.f32.mrf.mxu0  ;;  %v2024_v43 = vpop.f32.mrf.mxu1 }
 0x183   : > { %1439 = vst [vmem:[%s2955_s10] sm:$0xff] %v1431_v22  ;;  %v1417_v0 = vadd.f32 %v1389_v37, %v986_v24  ;;  %v1926_v3 = vadd.f32 %v1925_v41, %v1924_v19  ;;  %v707_v19 = vadd.f32 %v2910_v15, %v1837_v10 }
 0x184   : > { %v1927_v26 = vpop.f32.mrf.mxu0  ;;  %v1401_v4 = vpop.f32.mrf.mxu1 }
 0x185   : > { %v1432_v46 = vadd.f32 %v2947_v60, %v1417_v0  ;;  %v1394_v47 = vadd.f32 %v2020_v51, %v1926_v3  ;;  %v945_v24 = vadd.f32 %v1889_v35, %v707_v19 }
 0x186   : > { %v1928_v48 = vpop.f32.mrf.mxu0  ;;  %v2025_v54 = vpop.f32.mrf.mxu1 }
 0x187   : > { %1440 = vst [vmem:[%s2955_s10 + $0x8] sm:$0xff] %v1432_v46  ;;  %v1418_v50 = vadd.f32 %v1394_v47, %v991_v30  ;;  %v1929_v49 = vadd.f32 %v1928_v48, %v1927_v26  ;;  %v1010_v37 = vadd.f32 %v2931_v38, %v945_v24 }
 0x188   : > { %v1930_v52 = vpop.f32.mrf.mxu0  ;;  %v1404_v61 = vpop.f32.mrf.mxu1 }
 0x189   : > { %v1433_v51 = vadd.f32 %v2947_v60, %v1418_v50  ;;  %v1397_v53 = vadd.f32 %v2021_v63, %v1929_v49  ;;  %v704_v63 = vadd.f32 %v2898_v9, %v1834_v12 }
 0x18a   : > { %v1931_v8 = vpop.f32.mrf.mxu0 }
 0x18b   : > { %1441 = vst [vmem:[%s2955_s10 + $0x10] sm:$0xff] %v1433_v51  ;;  %v1419_v55 = vadd.f32 %v1397_v53, %v994_v29  ;;  %v1932_v56 = vadd.f32 %v1931_v8, %v1930_v52  ;;  %v942_v16 = vadd.f32 %v1886_v27, %v704_v63 }
 0x18c   : > { %v1933_v32 = vpop.f32.mrf.mxu0 }
 0x18d   : > { %v1434_v58 = vadd.f32 %v2947_v60, %v1419_v55  ;;  %v1402_v59 = vadd.f32 %v1932_v56, %v1401_v4  ;;  %v1007_v44 = vadd.f32 %v2920_v33, %v942_v16 }
 0x18e   : > { %v1934_v18 = vpop.f32.mrf.mxu0 }
 0x18f   : > { %1442 = vst [vmem:[%s2955_s10 + $0x18] sm:$0xff] %v1434_v58  ;;  %v1420_v11 = vadd.f32 %v1402_v59, %v999_v34  ;;  %v1935_v1 = vadd.f32 %v1934_v18, %v1933_v32 }
 0x190   : > { %v1936_v7 = vpop.f32.mrf.mxu0 }
 0x191   : > { %v1435_v36 = vadd.f32 %v2947_v60, %v1420_v11  ;;  %v1405_v17 = vadd.f32 %v1935_v1, %v1404_v61 }
 0x192   : > { %v1937_v9 = vpop.f32.mrf.mxu0 }
 0x193   : > { %1443 = vst [vmem:[%s2955_s10 + $0x20] sm:$0xff] %v1435_v36  ;;  %v1421_v13 = vadd.f32 %v1405_v17, %v1002_v23  ;;  %v1938_v14 = vadd.f32 %v1937_v9, %v1936_v7 }
 0x194   : > { %v1939_v21 = vpop.f32.mrf.mxu0 }
 0x195   : > { %v1436_v25 = vadd.f32 %v2947_v60, %v1421_v13  ;;  %v1410_v40 = vadd.f32 %v2024_v43, %v1938_v14 }
 0x196   : > { %v1940_v42 = vpop.f32.mrf.mxu0 }
 0x197   : > { %1444 = vst [vmem:[%s2955_s10 + $0x28] sm:$0xff] %v1436_v25  ;;  %v1422_v22 = vadd.f32 %v1410_v40, %v1007_v44  ;;  %v1941_v15 = vadd.f32 %v1940_v42, %v1939_v21 }
 0x199   : > { %v1437_v41 = vadd.f32 %v2947_v60, %v1422_v22  ;;  %v1413_v62 = vadd.f32 %v2025_v54, %v1941_v15 }
 0x19b   : > { %1445 = vst [vmem:[%s2955_s10 + $0x30] sm:$0xff] %v1437_v41  ;;  %v1423_v33 = vadd.f32 %v1413_v62, %v1010_v37 }
 0x19d   : > { %v1438_v43 = vadd.f32 %v2947_v60, %v1423_v33 }
 0x19f   : > { %1446 = vst [vmem:[%s2955_s10 + $0x38] sm:$0xff] %v1438_v43 }
 0x1a0   : > { %2341 = shalt.err (!%p2338_p11)
}
 0x1a1   : > { %s2342_s12 = scalar_lea.hbm %s3000_s6, 1024  ;;  %s2346_s28 = scalar_lea.hbm %s3115_s26, 4096 }
 0x1a2   : > { %p2343_p12 = scmp.ne.s32.totalorder %s3000_s6, %s2342_s12  ;;  %p2347_p6 = scmp.lt.s32.totalorder %s3000_s6, %s3115_s26 }
 0x1a3   : > { %p2348_p8 = scmp.lt.s32.totalorder %s2346_s28, %s2342_s12 }
 0x1a4   : > { %p2344_p0 = pnand %p2343_p12, %p2624_p13 }
 0x1a5   : > { %p2349_p10 = por %p2348_p8, %p2347_p6 }
 0x1a6   : > { %p2345_p3 = pneg %p2344_p0 }
 0x1a8   : > { %p2350_p1 = pnand %p2349_p10, %p2345_p3 }
 0x1aa   : > { %2353 = shalt.err (!%p2350_p1)
}
 0x1ab   : > { %s2486_s20 = smov 128   ;;  %s2487_s21 = smov 256  }
 0x1ac   : > { %s2488_s18 = smov 8  }
 0x1ad   : > { %2035 = dma.vmem_to_hbm [thread:$0]  (%p2624_p13), %s2994_s7, 1024, %s3000_s6, %s3006_s9, %s2486_s20, %s2487_s21, %s2488_s18  }
 0x1ae PF: > { %s3116_s22 = sld [smem:[#allocation11_spill]]  ;;  %p2049_p2 = scmp.ge.s32.totalorder %s2476_s25, 2 }
 0x1b0   : > { %p2045_p7 = pnand %p2049_p2, %p2632_p5 }
 0x1b2   : > { %p2046_p9 = pneg %p2045_p7 }
 0x1b4   : > { %s1477_s11 = sand.u32 1, %s3116_s22  }
 0x1b5   : > { %s1478_s27 = scalar_lea.sflag [#allocation4], %s1477_s11 }
 0x1b6   : > { %2419 = dma.done.wait (%p2046_p9), %s1478_s27, 1024  }
 0x1b7   : > { %2421 = vsyncadd (%p2046_p9), %s1478_s27, 4294966272  ;;  %s22_s25 = sadd.s32 1, %s2476_s25   ;;  %s3119_s30 = sld [smem:[#allocation12_spill]] }
 0x1b8   : > { %p3034_p4 = scmp.ge.s32.totalorder %s22_s25, 6   ;;  %s3120_s14 = sld [smem:[#allocation17_spill]] }
 0x1b9   : > { %s3121_s7 = sld [smem:[#allocation13_spill]]  ;;  %s3125_s12 = smov %s2428_s13 }
 0x1ba   : > { %s3122_s20 = sld [smem:[#allocation16_spill]]  ;;  %s3127_s15 = smov %s2440_s16 }
 0x1bb   : > { %s3123_s6 = sld [smem:[#allocation14_spill]]  ;;  %s3128_s16 = smov %s2444_s17 }
 0x1bc   : > { %s3124_s9 = sld [smem:[#allocation15_spill]]  ;;  %s3129_s17 = smov %s2662_s29 }
 0x1bd   : > { %s3126_s13 = smov %s3119_s30  ;;  %s3130_s18 = smov %s2452_s19 }
 0x1be   : > { %s3132_s21 = smov %s2468_s23  ;;  %s3133_s22 = smov %s2472_s24 }
 0x1bf   : > { %s3131_s19 = smov %s3121_s7  ;;  %21 = sbr.rel (!%p3034_p4) target bundleno = 14 (0xe), region = 95 }
 0x1c1   : > { %s3134_s23 = smov %s3123_s6 }
 0x1c2   : > { %s3135_s24 = smov %s3124_s9 }
 0x1c4   :  { %1483 = vsyncpa [#allocation3], 1 }
 0x1c5   :  { %1485 = vsyncpa [#allocation3 + $0x1], 1 }
 0x1c6   :  { %1486 = vsyncpa [#allocation6], 1 }
 0x1c7   :  { %1488 = vsyncpa [#allocation6 + $0x1], 1 }
 0x1c8   :  { %1489 = vsyncpa [#allocation4], 1 }
 0x1c9   :  { %1491 = vsyncpa [#allocation4 + $0x1], 1 }

</bundles_post_ra>
